<compile_context>
chip_gen: v5e
topology: v5e:2x2
jax: 0.10.0
libtpu: 0.0.40
codegen_flags: <defaults>
</compile_context>

<pallas_src>
import jax
import jax.numpy as jnp
from jax.experimental import pallas as pl
from jax.experimental.pallas import tpu as pltpu


def residual_conv1x1_kernel(x_ref, w_ref, b_ref, o_ref):
    """y[co, :] = x[co, :] + b[co] + sum_ci W[co, ci] * x[ci, :]   (fn(x) + x).

    x_ref / o_ref : (1, C, HW) VMEM tiles (one batch element; channels on
                    sublanes, pixels on lanes -> lane-dense).
    w_ref         : (C, C) in SMEM (scalar reads).
    b_ref         : (C,)   in SMEM (scalar reads).
    """
    C = x_ref.shape[1]
    x = x_ref[0]                                        # (C, HW), lives in vregs
    rows = []
    for co in range(C):                                 # static unroll (C == 4)
        acc = x[co:co + 1, :] + b_ref[co]               # residual + bias
        for ci in range(C):
            # VPU scalar * vector fused multiply-add; no MXU involvement.
            acc = acc + w_ref[co, ci] * x[ci:ci + 1, :]
        rows.append(acc)
    o_ref[0] = jnp.concatenate(rows, axis=0)            # single lane-dense store


def residual_forward(x_nchw, w, b):
    """Residual(fn=Conv2d(C, C, kernel_size=1)).forward(x) in NCHW, fully fused."""
    N, C, H, W = x_nchw.shape
    HW = H * W
    x3 = x_nchw.reshape(N, C, HW)                       # free: NCHW is contiguous

    out3 = pl.pallas_call(
        residual_conv1x1_kernel,
        out_shape=jax.ShapeDtypeStruct((N, C, HW), x_nchw.dtype),
        grid=(N,),
        in_specs=[
            pl.BlockSpec((1, C, HW), lambda n: (n, 0, 0)),          # x tile (VMEM)
            pl.BlockSpec(memory_space=pltpu.MemorySpace.SMEM),      # W scalars
            pl.BlockSpec(memory_space=pltpu.MemorySpace.SMEM),      # b scalars
        ],
        out_specs=pl.BlockSpec((1, C, HW), lambda n: (n, 0, 0)),
        input_output_aliases={0: 0},                    # write result in place of x
        compiler_params=pltpu.CompilerParams(
            dimension_semantics=("parallel",)),
    )(x3, w, b)
    return out3.reshape(N, C, H, W)


if __name__ == "__main__":
    key = jax.random.PRNGKey(0)
    kx, kw, kb = jax.random.split(key, 3)

    N, C, H, W = 2, 4, 16, 16
    x = jax.random.normal(kx, (N, C, H, W), dtype=jnp.float32)
    # fn = Conv2d(C, C, 1): weight (C_out, C_in), bias (C_out,)
    w = jax.random.normal(kw, (C, C), dtype=jnp.float32) * 0.1
    b = jax.random.normal(kb, (C,), dtype=jnp.float32) * 0.1

    # Reference computed BEFORE the kernel call (the kernel output may alias
    # the input buffer).
    ref = (jnp.einsum("oc,nchw->nohw", w, x,
                      precision=jax.lax.Precision.HIGHEST)
           + b[None, :, None, None]
           + x)

    out = residual_forward(x, w, b)
    jax.block_until_ready(out)

    assert out.shape == (N, C, H, W)
    assert jnp.allclose(out, ref, atol=1e-5, rtol=1e-5)

    print("KERNEL_OK")
</pallas_src>

<mosaic_0001>
module attributes {stable_mosaic.version = 11 : i64} {
  func.func @residual_conv1x1_kernel(%arg0: i32, %arg1: memref<1x4x256xf32, #tpu.memory_space<vmem>>, %arg2: memref<4x4xf32, #tpu.memory_space<smem>>, %arg3: memref<4xf32, #tpu.memory_space<smem>>, %arg4: memref<1x4x256xf32, #tpu.memory_space<vmem>>) attributes {dimension_semantics = [#tpu.dimension_semantics<parallel>], iteration_bounds = array<i64: 2>, scalar_prefetch = 0 : i64, scratch_operands = 0 : i64, tpu.core_type = #tpu.core_type<tc>, window_params = [{transform_indices = @transform_0, window_bounds = array<i64: 1, 4, 256>}, {transform_indices = @transform_1, window_bounds = array<i64: 4, 4>}, {transform_indices = @transform_2, window_bounds = array<i64: 4>}, {transform_indices = @transform_3, window_bounds = array<i64: 1, 4, 256>}]} {
    %c0 = arith.constant 0 : index
    %c0_0 = arith.constant 0 : index
    %c0_1 = arith.constant 0 : index
    %0 = vector.load %arg1[%c0, %c0_0, %c0_1] : memref<1x4x256xf32, #tpu.memory_space<vmem>>, vector<1x4x256xf32>
    %1 = vector.shape_cast %0 : vector<1x4x256xf32> to vector<4x256xf32>
    %2 = vector.extract_strided_slice %1 {offsets = [0, 0], sizes = [1, 256], strides = [1, 1]} : vector<4x256xf32> to vector<1x256xf32>
    %c0_2 = arith.constant 0 : index
    %3 = memref.load %arg3[%c0_2] : memref<4xf32, #tpu.memory_space<smem>>
    %4 = vector.broadcast %3 : f32 to vector<1x256xf32>
    %5 = arith.addf %2, %4 : vector<1x256xf32>
    %c0_3 = arith.constant 0 : index
    %c0_4 = arith.constant 0 : index
    %6 = memref.load %arg2[%c0_3, %c0_4] : memref<4x4xf32, #tpu.memory_space<smem>>
    %7 = vector.extract_strided_slice %1 {offsets = [0, 0], sizes = [1, 256], strides = [1, 1]} : vector<4x256xf32> to vector<1x256xf32>
    %8 = vector.broadcast %6 : f32 to vector<1x256xf32>
    %9 = arith.mulf %8, %7 : vector<1x256xf32>
    %10 = arith.addf %5, %9 : vector<1x256xf32>
    %c0_5 = arith.constant 0 : index
    %c1 = arith.constant 1 : index
    %11 = memref.load %arg2[%c0_5, %c1] : memref<4x4xf32, #tpu.memory_space<smem>>
    %12 = vector.extract_strided_slice %1 {offsets = [1, 0], sizes = [1, 256], strides = [1, 1]} : vector<4x256xf32> to vector<1x256xf32>
    %13 = vector.broadcast %11 : f32 to vector<1x256xf32>
    %14 = arith.mulf %13, %12 : vector<1x256xf32>
    %15 = arith.addf %10, %14 : vector<1x256xf32>
    %c0_6 = arith.constant 0 : index
    %c2 = arith.constant 2 : index
    %16 = memref.load %arg2[%c0_6, %c2] : memref<4x4xf32, #tpu.memory_space<smem>>
    %17 = vector.extract_strided_slice %1 {offsets = [2, 0], sizes = [1, 256], strides = [1, 1]} : vector<4x256xf32> to vector<1x256xf32>
    %18 = vector.broadcast %16 : f32 to vector<1x256xf32>
    %19 = arith.mulf %18, %17 : vector<1x256xf32>
    %20 = arith.addf %15, %19 : vector<1x256xf32>
    %c0_7 = arith.constant 0 : index
    %c3 = arith.constant 3 : index
    %21 = memref.load %arg2[%c0_7, %c3] : memref<4x4xf32, #tpu.memory_space<smem>>
    %22 = vector.extract_strided_slice %1 {offsets = [3, 0], sizes = [1, 256], strides = [1, 1]} : vector<4x256xf32> to vector<1x256xf32>
    %23 = vector.broadcast %21 : f32 to vector<1x256xf32>
    %24 = arith.mulf %23, %22 : vector<1x256xf32>
    %25 = arith.addf %20, %24 : vector<1x256xf32>
    %26 = vector.extract_strided_slice %1 {offsets = [1, 0], sizes = [1, 256], strides = [1, 1]} : vector<4x256xf32> to vector<1x256xf32>
    %c1_8 = arith.constant 1 : index
    %27 = memref.load %arg3[%c1_8] : memref<4xf32, #tpu.memory_space<smem>>
    %28 = vector.broadcast %27 : f32 to vector<1x256xf32>
    %29 = arith.addf %26, %28 : vector<1x256xf32>
    %c1_9 = arith.constant 1 : index
    %c0_10 = arith.constant 0 : index
    %30 = memref.load %arg2[%c1_9, %c0_10] : memref<4x4xf32, #tpu.memory_space<smem>>
    %31 = vector.extract_strided_slice %1 {offsets = [0, 0], sizes = [1, 256], strides = [1, 1]} : vector<4x256xf32> to vector<1x256xf32>
    %32 = vector.broadcast %30 : f32 to vector<1x256xf32>
    %33 = arith.mulf %32, %31 : vector<1x256xf32>
    %34 = arith.addf %29, %33 : vector<1x256xf32>
    %c1_11 = arith.constant 1 : index
    %c1_12 = arith.constant 1 : index
    %35 = memref.load %arg2[%c1_11, %c1_12] : memref<4x4xf32, #tpu.memory_space<smem>>
    %36 = vector.extract_strided_slice %1 {offsets = [1, 0], sizes = [1, 256], strides = [1, 1]} : vector<4x256xf32> to vector<1x256xf32>
    %37 = vector.broadcast %35 : f32 to vector<1x256xf32>
    %38 = arith.mulf %37, %36 : vector<1x256xf32>
    %39 = arith.addf %34, %38 : vector<1x256xf32>
    %c1_13 = arith.constant 1 : index
    %c2_14 = arith.constant 2 : index
    %40 = memref.load %arg2[%c1_13, %c2_14] : memref<4x4xf32, #tpu.memory_space<smem>>
    %41 = vector.extract_strided_slice %1 {offsets = [2, 0], sizes = [1, 256], strides = [1, 1]} : vector<4x256xf32> to vector<1x256xf32>
    %42 = vector.broadcast %40 : f32 to vector<1x256xf32>
    %43 = arith.mulf %42, %41 : vector<1x256xf32>
    %44 = arith.addf %39, %43 : vector<1x256xf32>
    %c1_15 = arith.constant 1 : index
    %c3_16 = arith.constant 3 : index
    %45 = memref.load %arg2[%c1_15, %c3_16] : memref<4x4xf32, #tpu.memory_space<smem>>
    %46 = vector.extract_strided_slice %1 {offsets = [3, 0], sizes = [1, 256], strides = [1, 1]} : vector<4x256xf32> to vector<1x256xf32>
    %47 = vector.broadcast %45 : f32 to vector<1x256xf32>
    %48 = arith.mulf %47, %46 : vector<1x256xf32>
    %49 = arith.addf %44, %48 : vector<1x256xf32>
    %50 = vector.extract_strided_slice %1 {offsets = [2, 0], sizes = [1, 256], strides = [1, 1]} : vector<4x256xf32> to vector<1x256xf32>
    %c2_17 = arith.constant 2 : index
    %51 = memref.load %arg3[%c2_17] : memref<4xf32, #tpu.memory_space<smem>>
    %52 = vector.broadcast %51 : f32 to vector<1x256xf32>
    %53 = arith.addf %50, %52 : vector<1x256xf32>
    %c2_18 = arith.constant 2 : index
    %c0_19 = arith.constant 0 : index
    %54 = memref.load %arg2[%c2_18, %c0_19] : memref<4x4xf32, #tpu.memory_space<smem>>
    %55 = vector.extract_strided_slice %1 {offsets = [0, 0], sizes = [1, 256], strides = [1, 1]} : vector<4x256xf32> to vector<1x256xf32>
    %56 = vector.broadcast %54 : f32 to vector<1x256xf32>
    %57 = arith.mulf %56, %55 : vector<1x256xf32>
    %58 = arith.addf %53, %57 : vector<1x256xf32>
    %c2_20 = arith.constant 2 : index
    %c1_21 = arith.constant 1 : index
    %59 = memref.load %arg2[%c2_20, %c1_21] : memref<4x4xf32, #tpu.memory_space<smem>>
    %60 = vector.extract_strided_slice %1 {offsets = [1, 0], sizes = [1, 256], strides = [1, 1]} : vector<4x256xf32> to vector<1x256xf32>
    %61 = vector.broadcast %59 : f32 to vector<1x256xf32>
    %62 = arith.mulf %61, %60 : vector<1x256xf32>
    %63 = arith.addf %58, %62 : vector<1x256xf32>
    %c2_22 = arith.constant 2 : index
    %c2_23 = arith.constant 2 : index
    %64 = memref.load %arg2[%c2_22, %c2_23] : memref<4x4xf32, #tpu.memory_space<smem>>
    %65 = vector.extract_strided_slice %1 {offsets = [2, 0], sizes = [1, 256], strides = [1, 1]} : vector<4x256xf32> to vector<1x256xf32>
    %66 = vector.broadcast %64 : f32 to vector<1x256xf32>
    %67 = arith.mulf %66, %65 : vector<1x256xf32>
    %68 = arith.addf %63, %67 : vector<1x256xf32>
    %c2_24 = arith.constant 2 : index
    %c3_25 = arith.constant 3 : index
    %69 = memref.load %arg2[%c2_24, %c3_25] : memref<4x4xf32, #tpu.memory_space<smem>>
    %70 = vector.extract_strided_slice %1 {offsets = [3, 0], sizes = [1, 256], strides = [1, 1]} : vector<4x256xf32> to vector<1x256xf32>
    %71 = vector.broadcast %69 : f32 to vector<1x256xf32>
    %72 = arith.mulf %71, %70 : vector<1x256xf32>
    %73 = arith.addf %68, %72 : vector<1x256xf32>
    %74 = vector.extract_strided_slice %1 {offsets = [3, 0], sizes = [1, 256], strides = [1, 1]} : vector<4x256xf32> to vector<1x256xf32>
    %c3_26 = arith.constant 3 : index
    %75 = memref.load %arg3[%c3_26] : memref<4xf32, #tpu.memory_space<smem>>
    %76 = vector.broadcast %75 : f32 to vector<1x256xf32>
    %77 = arith.addf %74, %76 : vector<1x256xf32>
    %c3_27 = arith.constant 3 : index
    %c0_28 = arith.constant 0 : index
    %78 = memref.load %arg2[%c3_27, %c0_28] : memref<4x4xf32, #tpu.memory_space<smem>>
    %79 = vector.extract_strided_slice %1 {offsets = [0, 0], sizes = [1, 256], strides = [1, 1]} : vector<4x256xf32> to vector<1x256xf32>
    %80 = vector.broadcast %78 : f32 to vector<1x256xf32>
    %81 = arith.mulf %80, %79 : vector<1x256xf32>
    %82 = arith.addf %77, %81 : vector<1x256xf32>
    %c3_29 = arith.constant 3 : index
    %c1_30 = arith.constant 1 : index
    %83 = memref.load %arg2[%c3_29, %c1_30] : memref<4x4xf32, #tpu.memory_space<smem>>
    %84 = vector.extract_strided_slice %1 {offsets = [1, 0], sizes = [1, 256], strides = [1, 1]} : vector<4x256xf32> to vector<1x256xf32>
    %85 = vector.broadcast %83 : f32 to vector<1x256xf32>
    %86 = arith.mulf %85, %84 : vector<1x256xf32>
    %87 = arith.addf %82, %86 : vector<1x256xf32>
    %c3_31 = arith.constant 3 : index
    %c2_32 = arith.constant 2 : index
    %88 = memref.load %arg2[%c3_31, %c2_32] : memref<4x4xf32, #tpu.memory_space<smem>>
    %89 = vector.extract_strided_slice %1 {offsets = [2, 0], sizes = [1, 256], strides = [1, 1]} : vector<4x256xf32> to vector<1x256xf32>
    %90 = vector.broadcast %88 : f32 to vector<1x256xf32>
    %91 = arith.mulf %90, %89 : vector<1x256xf32>
    %92 = arith.addf %87, %91 : vector<1x256xf32>
    %c3_33 = arith.constant 3 : index
    %c3_34 = arith.constant 3 : index
    %93 = memref.load %arg2[%c3_33, %c3_34] : memref<4x4xf32, #tpu.memory_space<smem>>
    %94 = vector.extract_strided_slice %1 {offsets = [3, 0], sizes = [1, 256], strides = [1, 1]} : vector<4x256xf32> to vector<1x256xf32>
    %95 = vector.broadcast %93 : f32 to vector<1x256xf32>
    %96 = arith.mulf %95, %94 : vector<1x256xf32>
    %97 = arith.addf %92, %96 : vector<1x256xf32>
    %98 = tpu.concatenate %25, %49, %73, %97 in 0 : vector<1x256xf32>, vector<1x256xf32>, vector<1x256xf32>, vector<1x256xf32> -> vector<4x256xf32>
    %c0_35 = arith.constant 0 : index
    %c0_36 = arith.constant 0 : index
    %c0_37 = arith.constant 0 : index
    %99 = vector.load %arg4[%c0_35, %c0_36, %c0_37] : memref<1x4x256xf32, #tpu.memory_space<vmem>>, vector<1x4x256xf32>
    %100 = vector.shape_cast %99 : vector<1x4x256xf32> to vector<4x256xf32>
    %101 = vector.shape_cast %98 : vector<4x256xf32> to vector<1x4x256xf32>
    tpu.vector_store %arg4[%c0_35, %c0_36, %c0_37], %101 {strides = array<i32>} : memref<1x4x256xf32, #tpu.memory_space<vmem>>, vector<1x4x256xf32>,
    return
  }
  func.func @transform_0(%arg0: i32) -> (i32, i32, i32) {
    %c0_i32 = arith.constant 0 : i32
    %c0_i32_0 = arith.constant 0 : i32
    %c0_i32_1 = arith.constant 0 : i32
    return %arg0, %c0_i32, %c0_i32_0 : i32, i32, i32
  }
  func.func @transform_1(%arg0: i32) -> (i32, i32) {
    %c0_i32 = arith.constant 0 : i32
    %c0_i32_0 = arith.constant 0 : i32
    %c0_i32_1 = arith.constant 0 : i32
    return %c0_i32, %c0_i32_0 : i32, i32
  }
  func.func @transform_2(%arg0: i32) -> i32 {
    %c0_i32 = arith.constant 0 : i32
    %c0_i32_0 = arith.constant 0 : i32
    return %c0_i32 : i32
  }
  func.func @transform_3(%arg0: i32) -> (i32, i32, i32) {
    %c0_i32 = arith.constant 0 : i32
    %c0_i32_0 = arith.constant 0 : i32
    %c0_i32_1 = arith.constant 0 : i32
    return %arg0, %c0_i32, %c0_i32_0 : i32, i32, i32
  }
}

</mosaic_0001>

<bundles_post_ra>
// kernel: tpu_custom_call.1
= control target key start
LH: loop header
LB: loop body
LE: loop exit
PB: predicated region body
PF: predicated region fallthrough
CT: control target
= control target key end

     0   :  { %8 = vsyncpa [#allocation3], 0  ;;  %s929_s0 = inlined_call_operand.hbm [shape: f32[2,4,256], index: 0, kind: input, shape index: {}, may-alias: {0,3}]   ;;  %s930_s1 = inlined_call_operand.vmem [shape: f32[4,4], index: 1, kind: input, shape index: {}]   ;;  %s931_s2 = inlined_call_operand.vmem [shape: f32[4], index: 2, kind: input, shape index: {}]   ;;  %s932_s3 = inlined_call_operand.hbm [shape: f32[2,4,256], index: 3, kind: output, shape index: {}, may-alias: {0,3}]  }
   0x1   :  { %10 = vsyncpa [#allocation3 + $0x1], 0 }
   0x2   :  { %11 = vsyncpa [#allocation5], 0 }
   0x3   :  { %12 = vsyncpa [#allocation8], 0 }
   0x4   :  { %13 = vsyncpa [#allocation4], 0 }
   0x5   :  { %15 = vsyncpa [#allocation4 + $0x1], 0  ;;  %s749_s12 = smov 0   ;;  %s751_s13 = smov 0  }
   0x6   :  { %s753_s14 = smov 0   ;;  %s755_s15 = smov 0  }
   0x7 LB: > { %s770_s16 = sadd.s32 4294967295, %s725_s15   ;;  %s480_s17 = sadd.s32 4294967294, %s725_s15   ;;  %s725_s15 = sphi %s755_s15, %s942_s15   ;;  %s721_s14 = sphi %s753_s14, %s941_s14   ;;  %s717_s13 = sphi %s751_s13, %s940_s13   ;;  %s713_s12 = sphi %s749_s12, %s939_s12  }
   0x8   : > { %p41_p0 = scmp.ne.s32.totalorder %s717_s13, %s713_s12  ;;  %p42_p1 = scmp.eq.s32.totalorder %s770_s16, 0 }
   0x9   : > { %p107_p2 = scmp.eq.s32.totalorder %s770_s16, 1  ;;  %p113_p3 = scmp.eq.s32.totalorder %s480_s17, 1 }
   0xa   : > { %p779_p4 = por %p42_p1, %p41_p0  ;;  %p481_p5 = scmp.ge.s32.totalorder %s725_s15, 1 }
   0xb   : > { %p784_p6 = por %p113_p3, %p41_p0  ;;  %p120_p7 = scmp.lt.s32.totalorder %s725_s15, 3 }
   0xc   : > { %s132_s22 = sshll.u32 %s930_s1, 4  ;;  %s142_s26 = sshll.u32 %s931_s2, 4  ;;  %s133_s22 = int_to_ptr.vmem [resolvable:$true] %s132_s22  ;;  %s143_s26 = int_to_ptr.vmem [resolvable:$true] %s142_s26 }
   0xd   : > { %p792_p8 = pnand %p481_p5, %p120_p7  ;;  %s805_s27 = sadd.s32 1, %s725_s15  }
   0xe   : > { %s25_s28 = ssub.s32 %s725_s15, %s805_s27  ;;  %s727_s29 = smov [#allocation6]  }
   0xf   : > { %p536_p10 = pneg %p792_p8  ;;  %s728_s30 = smov [#allocation7]  }
  0x10   : > { %p26_p12 = scmp.eq.s32.totalorder %s25_s28, 0  ;;  %s28_s4 = sadd.s32 1, %s721_s14 }
  0x11   : > { %p537_p11 = pnand %p536_p10, %p42_p1  ;;  %p35_p13 = scmp.ne.s32.totalorder %s721_s14, %s717_s13 }
  0x12   : > { %p36_p0 = scmp.eq.s32.totalorder %s725_s15, 0  ;;  %p553_p7 = scmp.lt.s32.totalorder %s725_s15, 2 }
  0x13   : > { %539 = dma.vmem_to_smem (!%p537_p11), %s133_s22, 64, %s727_s29, [#allocation5]  }
  0x14   : > { %542 = dma.vmem_to_smem (!%p537_p11), %s143_s26, 16, %s728_s30, [#allocation8]  }
  0x15   : > { %s814_s5 = scalar_select %p26_p12, %s721_s14, %s28_s4  }
  0x16   : > { %p37_p3 = por %p36_p0, %p35_p13  ;;  %p818_p5 = por %p107_p2, %p35_p13 }
  0x17   : > { %s153_s7 = sand.u32 1, %s721_s14   ;;  %s522_s9 = sshll.u32 %s725_s15, 3 }
  0x18   : > { %s485_s8 = sshll.u32 %s153_s7, 3  ;;  %s162_s17 = scalar_lea.hbm %s929_s0, %s522_s9 }
  0x19   : > { %s157_s20 = scalar_lea.vmem [#allocation2], %s485_s8  ;;  %s164_s22 = sshll.u32 %s162_s17, 4  ;;  %s165_s22 = int_to_ptr.hbm [resolvable:$true] %s164_s22 }
  0x1a   : > { %s166_s21 = sshll.u32 %s157_s20, 4  ;;  %p828_p10 = pnand %p553_p7, %p37_p3  ;;  %s167_s21 = int_to_ptr.vmem [resolvable:$true] %s166_s21 }
  0x1b   : > { %s154_s25 = scalar_lea.sflag [#allocation3], %s153_s7  ;;  %s621_s26 = sshra.s32 %s165_s22, 4  ;;  %s622_s26 = int_to_ptr.hbm [resolvable:$true] %s621_s26 }
  0x1c   : > { %s623_s28 = scalar_lea.hbm %s622_s26, 8  ;;  %p625_p11 = pneg %p828_p10 }
  0x1d   : > { %p624_p2 = scmp.ne.s32.totalorder %s622_s26, %s623_s28  ;;  %s628_s4 = scalar_lea.hbm %s929_s0, 16 }
  0x1e   : > { %p629_p0 = scmp.lt.s32.totalorder %s622_s26, %s929_s0  ;;  %p630_p3 = scmp.lt.s32.totalorder %s628_s4, %s623_s28 }
  0x1f   : > { %p626_p12 = pnand %p625_p11, %p624_p2 }
  0x20   : > { %p631_p7 = por %p630_p3, %p629_p0 }
  0x21   : > { %p627_p13 = pneg %p626_p12 }
  0x23   : > { %p632_p9 = pnand %p631_p7, %p627_p13 }
  0x25   : > { %635 = shalt.err (!%p632_p9)
}
  0x26   : > { %546 = dma.hbm_to_vmem [thread:$0]  (!%p828_p10), %s165_s22, 128, %s167_s21, %s154_s25  }
  0x27   : > { %175 = sbr.rel (%p792_p8) target bundleno = 95 (0x5f), region = 32  ;;  %s845_s7 = sand.u32 (!%p792_p8), 1, %s717_s13  }
  0x28   : > { %s489_s10 = sshll.u32 (!%p792_p8), %s845_s7, 3  ;;  %s178_s11 = scalar_lea.sflag (!%p792_p8), [#allocation3], %s845_s7 }
  0x29   : > { %s181_s17 = scalar_lea.vmem (!%p792_p8), [#allocation2], %s489_s10 }
  0x2c   : > { %696 = dma.done.wait (%p779_p4), %s178_s11, 128  }
  0x2d   : > { %698 = vsyncadd (%p779_p4), %s178_s11, 4294967168 }
  0x2e   : > { %700 = dma.done.wait (%p42_p1), [#allocation5], 64  }
  0x2f   : > { %702 = vsyncadd (%p42_p1), [#allocation5], 4294967232 }
  0x30   : > { %704 = dma.done.wait (%p42_p1), [#allocation8], 16  }
  0x31   : > { %706 = vsyncadd (%p42_p1), [#allocation8], 4294967280 }
  0x32   : > { %197 = sfence }
  0x33   : > { %s217_s23 = sld [smem:[#allocation7]]  ;;  %v863_v0 = vld [vmem:[%s181_s17] sm:$0xff]  ;;  %vm355_vm0 = vcmask 1040384   ;;  %vm358_vm1 = vcmask 1041408   ;;  %vm361_vm2 = vcmask 1042432   ;;  %vm367_vm3 = vcmask 1043456  }
  0x34   : > { %s220_s20 = sld [smem:[#allocation6]] }
  0x35   : > { %s493_s21 = sld [smem:[#allocation6 + $0x1]] }
  0x36   : > { %s495_s22 = sld [smem:[#allocation6 + $0x2]] }
  0x37   : > { %s497_s24 = sld [smem:[#allocation6 + $0x3]] }
  0x38   : > { %s499_s18 = sld [smem:[#allocation7 + $0x1]] }
  0x39   : > { %v218_v1 = vstv %s217_s23  ;;  %s500_s25 = sld [smem:[#allocation6 + $0x80]] }
  0x3a   : > { %v219_v2 = vadd.f32 %v218_v1, %v863_v0  ;;  %v221_v3 = vstv %s220_s20  ;;  %s501_s26 = sld [smem:[#allocation6 + $0x81]] }
  0x3b   : > { %v222_v4 = vmul.f32 %v221_v3, %v863_v0  ;;  %v225_v5 = vstv %s493_s21  ;;  %s502_s28 = sld [smem:[#allocation6 + $0x82]] }
  0x3c   : > { %v226_v6 = vmul.f32 %v225_v5, %v863_v0  ;;  %v233_v7 = vstv %s495_s22  ;;  %s504_s29 = sld [smem:[#allocation6 + $0x83]] }
  0x3d   : > { %v223_v8 = vadd.f32 %v222_v4, %v219_v2  ;;  %v234_v9 = vmul.f32 %v233_v7, %v863_v0  ;;  %v241_v10 = vstv %s497_s24  ;;  %s506_s30 = sld [smem:[#allocation7 + $0x2]]  ;;  %s523_s24 = sshll.u32 %s770_s16, 3 }
  0x3e   : > { %v494_v11 = vrot.slane %v226_v6, 9  ;;  %v249_v12 = vstv %s499_s18  ;;  %s869_s4 = sld [smem:[#allocation6 + $0x100]]  ;;  %v242_v14 = vmul.f32 %v241_v10, %v863_v0 }
  0x3f   : > { %v252_v13 = vstv %s500_s25  ;;  %s508_s8 = sld [smem:[#allocation6 + $0x101]]  ;;  %v250_v15 = vadd.f32 %v249_v12, %v863_v0  ;;  %v496_v19 = vrot.slane %v234_v9, 10 }
  0x40   : > { %v253_v16 = vmul.f32 %v252_v13, %v863_v0  ;;  %v259_v17 = vstv %s501_s26  ;;  %s874_s9 = sld [smem:[#allocation6 + $0x102]]  ;;  %v231_v18 = vadd.f32 %v494_v11, %v223_v8  ;;  %v498_v27 = vrot.slane %v242_v14, 11  ;;  %s383_s26 = scalar_lea.hbm %s932_s3, %s523_s24 }
  0x41   : > { %v263_v20 = vstv %s502_s28  ;;  %s510_s11 = sld [smem:[#allocation6 + $0x103]]  ;;  %v260_v22 = vmul.f32 %v259_v17, %v863_v0  ;;  %s215_s28 = scalar_lea.vmem [#allocation9], %s489_s10 }
  0x42   : > { %v255_v21 = vrot.slane %v253_v16, 7  ;;  %v264_v23 = vmul.f32 %v263_v20, %v863_v0  ;;  %v271_v24 = vstv %s504_s29  ;;  %s512_s17 = sld [smem:[#allocation7 + $0x3]]  ;;  %v239_v30 = vadd.f32 %v496_v19, %v231_v18  ;;  %s385_s29 = sshll.u32 %s215_s28, 4  ;;  %s386_s29 = int_to_ptr.vmem [resolvable:$true] %s385_s29 }
  0x43   : > { %v272_v25 = vmul.f32 %v271_v24, %v863_v0  ;;  %v279_v26 = vstv %s506_s30  ;;  %s513_s23 = sld [smem:[#allocation6 + $0x180]]  ;;  %s387_s16 = sshll.u32 %s383_s26, 4  ;;  %s388_s16 = int_to_ptr.hbm [resolvable:$true] %s387_s16 }
  0x44   : > { %v257_v28 = vadd.f32 %v255_v21, %v250_v15  ;;  %v503_v29 = vrot.slane %v264_v23, 9  ;;  %s514_s20 = sld [smem:[#allocation6 + $0x181]]  ;;  %v280_v31 = vadd.f32 %v279_v26, %v863_v0  ;;  %v282_v32 = vstv %s869_s4  ;;  %s372_s30 = scalar_lea.sflag [#allocation4], %s845_s7 }
  0x45   : > { %v289_v33 = vstv %s508_s8  ;;  %s515_s21 = sld [smem:[#allocation6 + $0x182]]  ;;  %v505_v35 = vrot.slane %v272_v25, 10  ;;  %v283_v36 = vmul.f32 %v282_v32, %v863_v0  ;;  %v247_v46 = vadd.f32 %v498_v27, %v239_v30  ;;  %s665_s4 = sshra.s32 %s388_s16, 4  ;;  %s666_s4 = int_to_ptr.hbm [resolvable:$true] %s665_s4 }
  0x46   : > { %v261_v34 = vadd.f32 %v260_v22, %v257_v28  ;;  %v290_v37 = vmul.f32 %v289_v33, %v863_v0  ;;  %s883_s22 = sld [smem:[#allocation6 + $0x183]]  ;;  %v296_v38 = vstv %s874_s9  ;;  %s667_s8 = scalar_lea.hbm %s666_s4, 8 }
  0x47   : > { %v300_v39 = vstv %s510_s11  ;;  %v285_v41 = vrot.slane %v283_v36, 6  ;;  %v297_v49 = vmul.f32 %v296_v38, %v863_v0  ;;  %v336_v59 = vperm.slane %v247_v46, 0  ;;  %p668_p1 = scmp.ne.s32.totalorder %s666_s4, %s667_s8  ;;  %s671_s11 = scalar_lea.hbm %s932_s3, 16 }
  0x48   : > { %v269_v40 = vadd.f32 %v503_v29, %v261_v34  ;;  %v292_v42 = vrot.slane %v290_v37, 7  ;;  %v301_v43 = vmul.f32 %v300_v39, %v863_v0  ;;  %v308_v44 = vstv %s512_s17  ;;  %p672_p9 = scmp.lt.s32.totalorder %s666_s4, %s932_s3  ;;  %p673_p10 = scmp.lt.s32.totalorder %s671_s11, %s667_s8 }
  0x49   : > { %v311_v45 = vstv %s513_s23  ;;  %v287_v48 = vadd.f32 %v285_v41, %v280_v31  ;;  %v309_v50 = vadd.f32 %v308_v44, %v863_v0  ;;  %v337_v63 = vperm.slane %v247_v46, 4  ;;  %p669_p4 = pnand %p668_p1, %p818_p5 }
  0x4a   : > { %v277_v47 = vadd.f32 %v505_v35, %v269_v40  ;;  %v312_v51 = vmul.f32 %v311_v45, %v863_v0  ;;  %v318_v52 = vstv %s514_s20  ;;  %v511_v55 = vrot.slane %v301_v43, 9  ;;  %p674_p2 = por %p673_p10, %p672_p9 }
  0x4b   : > { %v325_v53 = vstv %s515_s21  ;;  %v294_v54 = vadd.f32 %v292_v42, %v287_v48  ;;  %v319_v56 = vmul.f32 %v318_v52, %v863_v0  ;;  %p670_p8 = pneg %p669_p4 }
  0x4c   : > { %v326_v57 = vmul.f32 %v325_v53, %v863_v0  ;;  %v314_v58 = vrot.slane %v312_v51, 5  ;;  %v332_v62 = vstv %s883_s22  ;;  %v341_v3 = vperm.slane %v277_v47, 1 }
  0x4d   : > { %v298_v60 = vadd.f32 %v297_v49, %v294_v54  ;;  %v321_v61 = vrot.slane %v319_v56, 6  ;;  %v342_v4 = vperm.slane %v277_v47, 5  ;;  %v333_v7 = vmul.f32 %v332_v62, %v863_v0  ;;  %p675_p11 = pnand %p674_p2, %p670_p8 }
  0x4e   : > { %v316_v1 = vadd.f32 %v314_v58, %v309_v50  ;;  %v328_v2 = vrot.slane %v326_v57, 7  ;;  %v356_v11 = vsel %vm355_vm0, %v336_v59, %v341_v3 }
  0x4f   : > { %v306_v5 = vadd.f32 %v511_v55, %v298_v60  ;;  %v357_v12 = vsel %vm355_vm0, %v337_v63, %v342_v4 }
  0x50   : > { %v323_v6 = vadd.f32 %v321_v61, %v316_v1 }
  0x51   : > { %v346_v8 = vperm.slane %v306_v5, 2  ;;  %v347_v9 = vperm.slane %v306_v5, 6 }
  0x52   : > { %v330_v10 = vadd.f32 %v328_v2, %v323_v6 }
  0x53   : > { %v359_v14 = vsel %vm358_vm1, %v356_v11, %v346_v8  ;;  %v360_v15 = vsel %vm358_vm1, %v357_v12, %v347_v9 }
  0x54   : > { %v334_v13 = vadd.f32 %v333_v7, %v330_v10 }
  0x56   : > { %v351_v16 = vperm.slane %v334_v13, 3  ;;  %v352_v17 = vperm.slane %v334_v13, 7 }
  0x58   : > { %v362_v0 = vsel %vm361_vm2, %v359_v14, %v351_v16  ;;  %v363_v18 = vsel %vm361_vm2, %v360_v15, %v352_v17 }
  0x59   : > { %v366_v19 = vrot.slane %v363_v18, 4 }
  0x5b   : > { %v368_v20 = vsel %vm367_vm3, %v362_v0, %v366_v19 }
  0x5c   : > { %370 = vst [vmem:[%s215_s28] sm:$0xff] %v368_v20 }
  0x5d   : > { %678 = shalt.err (!%p675_p11)
}
  0x5e   : > { %534 = dma.vmem_to_hbm [thread:$0]  (%p818_p5), %s386_s29, 128, %s388_s16, %s372_s30  }
  0x5f PF: > { %s399_s7 = sand.u32 1, %s713_s12   ;;  %p938_p12 = scmp.ge.s32.totalorder %s725_s15, 2 }
  0x60   : > { %s400_s20 = scalar_lea.sflag [#allocation4], %s399_s7 }
  0x61   : > { %p548_p13 = pnand %p938_p12, %p784_p6 }
  0x63   : > { %p549_p0 = pneg %p548_p13 }
  0x65   : > { %708 = dma.done.wait (%p549_p0), %s400_s20, 128  }
  0x66   : > { %710 = vsyncadd (%p549_p0), %s400_s20, 4294967168  ;;  %p18_p3 = scmp.ge.s32.totalorder %s805_s27, 4   ;;  %s939_s12 = smov %s717_s13 }
  0x67   : > { %s940_s13 = smov %s721_s14  ;;  %s941_s14 = smov %s814_s5 }
  0x68   : > { %s942_s15 = smov %s805_s27  ;;  %20 = sbr.rel (!%p18_p3) target bundleno = 7 (0x7), region = 86 }
  0x6d   :  { %406 = vsyncpa [#allocation3], 1 }
  0x6e   :  { %408 = vsyncpa [#allocation3 + $0x1], 1 }
  0x6f   :  { %409 = vsyncpa [#allocation4], 1 }
  0x70   :  { %411 = vsyncpa [#allocation4 + $0x1], 1 }
  0x71   :  { %412 = vsyncpa [#allocation5], 1 }
  0x72   :  { %414 = vsyncpa [#allocation5 + $0x1], 1 }
  0x73   :  { %415 = vsyncpa [#allocation8], 1 }

</bundles_post_ra>
